<compile_context>
chip_gen: v7x
topology: tpu7x:2x2x1
jax: 0.10.0
libtpu: 0.0.40
codegen_flags: <defaults>
</compile_context>

<pallas_src>
import functools

import jax
import jax.numpy as jnp
from jax.experimental import pallas as pl
from jax.experimental.pallas import tpu as pltpu


def _bin_cb_loss_kernel(x_ref, t_ref, out_ref, *, w0, w1, batch, tile_b):
    i = pl.program_id(0)

    # --- accumulator init (output block is resident across the whole grid) ---
    @pl.when(i == 0)
    def _init():
        out_ref[...] = jnp.zeros_like(out_ref)

    x = x_ref[...].astype(jnp.float32)       # (2, tile_b)  lane-dense: batch on lanes
    t = t_ref[...]                           # (1, tile_b)  int32 labels in {0, 1}

    x0 = x[0:1, :]                           # logits for class 0
    x1 = x[1:2, :]                           # logits for class 1
    is0 = t == 0

    # --- binary log-softmax gather: logpt = log_softmax(x)[t] = -softplus(x_other - x_true)
    diff = x1 - x0
    d = jnp.where(is0, diff, -diff)          # x_other - x_true
    # numerically stable softplus(d) = max(d, 0) + log(1 + exp(-|d|))
    logpt = -(jnp.maximum(d, 0.0) + jnp.log(1.0 + jnp.exp(-jnp.abs(d))))

    # --- class-balance weight: trace-time constants selected per sample ---
    w = jnp.where(is0, jnp.float32(w0), jnp.float32(w1))
    contrib = -w * logpt                     # (1, tile_b)

    # --- mask out-of-range lanes of the (possibly padded) last tile ---
    lane = jax.lax.broadcasted_iota(jnp.int32, (1, tile_b), 1)
    valid = (i * tile_b + lane) < batch
    partial = jnp.sum(jnp.where(valid, contrib, 0.0), axis=1, keepdims=True)  # (1, 1)

    out_ref[...] += partial

    @pl.when(i == pl.num_programs(0) - 1)
    def _finalize():
        out_ref[...] = out_ref[...] / jnp.float32(batch)


def bin_class_balance_loss(x, target, *, beta, num_n, num_vs, max_tile_b=4096):
    """x: (B, 2) float logits (any float dtype); target: (B,) integer labels in {0, 1}."""
    B, C = x.shape
    assert C == 2, "BinClassBalanceLoss is a binary loss (2 logits per sample)."

    beta = float(beta)
    num_n = float(num_n)
    num_vs = float(num_vs)

    # Precompute the two normalized class-balance weights in double precision.
    a0 = (1.0 - beta) / (1.0 - beta ** num_n)    # weight numerator for label 0
    a1 = (1.0 - beta) / (1.0 - beta ** num_vs)   # weight numerator for label != 0
    s = a0 + a1
    w0 = a0 / s
    w1 = a1 / s

    # Lane-dense layout: classes on sublanes, batch on lanes.  Native dtype goes
    # straight to the kernel (cast to f32 happens on-chip).
    xt = x.T                                      # (2, B)
    t = target.reshape(1, B).astype(jnp.int32)    # (1, B)

    # Batch tile: full array if it fits one lane tile, otherwise a multiple of 128.
    if B <= 128:
        tile_b = B
    else:
        tile_b = min(max_tile_b, ((B + 127) // 128) * 128)
    grid = (pl.cdiv(B, tile_b),)

    kernel = functools.partial(
        _bin_cb_loss_kernel, w0=w0, w1=w1, batch=B, tile_b=tile_b
    )

    out = pl.pallas_call(
        kernel,
        out_shape=jax.ShapeDtypeStruct((1, 1), jnp.float32),
        grid=grid,
        in_specs=[
            pl.BlockSpec((C, tile_b), lambda i: (0, i)),
            pl.BlockSpec((1, tile_b), lambda i: (0, i)),
        ],
        # Same (1,1) block for every grid step -> resident accumulator, one writeback.
        out_specs=pl.BlockSpec((1, 1), lambda i: (0, 0)),
        compiler_params=pltpu.CompilerParams(
            dimension_semantics=("arbitrary",),
        ),
        cost_estimate=pl.CostEstimate(
            flops=12 * B,
            transcendentals=2 * B,
            bytes_accessed=B * C * x.dtype.itemsize + B * 4 + 4,
        ),
    )(xt, t)
    return out[0, 0]


def _reference(x, target, *, beta, num_n, num_vs):
    # Pure-JAX reference mirroring the PyTorch forward, for a sanity check.
    logp = jax.nn.log_softmax(x.astype(jnp.float32), axis=1)
    logpt = jnp.take_along_axis(logp, target.reshape(-1, 1), axis=1).reshape(-1)
    w_count = jnp.where(target == 0, float(num_n), float(num_vs))
    w = (1.0 - beta) / (1.0 - beta ** w_count)
    sum_ = (1.0 - beta) / (1.0 - beta ** num_n) + (1.0 - beta) / (1.0 - beta ** num_vs)
    w = w / sum_
    return jnp.mean(-1.0 * w * logpt)


if __name__ == "__main__":
    key = jax.random.PRNGKey(0)
    beta, num_n, num_vs = 0.999, 100.0, 10.0

    # Test 1: small batch, single tile (tile_b == B).
    k1x, k1t, k2x, k2t = jax.random.split(key, 4)
    B1 = 384
    x1 = jax.random.normal(k1x, (B1, 2), dtype=jnp.float32)
    t1 = jax.random.randint(k1t, (B1,), 0, 2, dtype=jnp.int32)
    loss1 = bin_class_balance_loss(x1, t1, beta=beta, num_n=num_n, num_vs=num_vs)
    loss1 = jax.block_until_ready(loss1)
    ref1 = _reference(x1, t1, beta=beta, num_n=num_n, num_vs=num_vs)
    assert jnp.allclose(loss1, ref1, rtol=1e-5, atol=1e-5), (loss1, ref1)

    # Test 2: batch not a multiple of the tile -> multi-step grid + masked tail tile.
    B2 = 300
    x2 = jax.random.normal(k2x, (B2, 2), dtype=jnp.float32)
    t2 = jax.random.randint(k2t, (B2,), 0, 2, dtype=jnp.int32)
    loss2 = bin_class_balance_loss(
        x2, t2, beta=beta, num_n=num_n, num_vs=num_vs, max_tile_b=128
    )
    loss2 = jax.block_until_ready(loss2)
    ref2 = _reference(x2, t2, beta=beta, num_n=num_n, num_vs=num_vs)
    assert jnp.allclose(loss2, ref2, rtol=1e-5, atol=1e-5), (loss2, ref2)

    print("KERNEL_OK")
</pallas_src>

<mosaic_0001>
module attributes {stable_mosaic.version = 11 : i64} {
  func.func @_bin_cb_loss_kernel(%arg0: i32, %arg1: memref<2x384xf32, #tpu.memory_space<vmem>>, %arg2: memref<1x384xi32, #tpu.memory_space<vmem>>, %arg3: memref<1x1xf32, #tpu.memory_space<vmem>>) attributes {dimension_semantics = [#tpu.dimension_semantics<arbitrary>], iteration_bounds = array<i64: 1>, scalar_prefetch = 0 : i64, scratch_operands = 0 : i64, tpu.core_type = #tpu.core_type<tc>, window_params = [{transform_indices = @transform_0, window_bounds = array<i64: 2, 384>}, {transform_indices = @transform_1, window_bounds = array<i64: 1, 384>}, {pipeline_mode = #tpu.pipeline_mode<synchronous>, transform_indices = @transform_2, window_bounds = array<i64: 1, 1>}]} {
    %c0_i32 = arith.constant 0 : i32
    %0 = arith.cmpi eq, %arg0, %c0_i32 : i32
    %1 = arith.extui %0 : i1 to i32
    %c0_i32_0 = arith.constant 0 : i32
    %2 = arith.cmpi ne, %1, %c0_i32_0 : i32
    scf.if %2 {
      %cst_21 = arith.constant 0.000000e+00 : f32
      %47 = vector.broadcast %cst_21 : f32 to vector<1x1xf32>
      %c0_22 = arith.constant 0 : index
      %c0_23 = arith.constant 0 : index
      %48 = vector.load %arg3[%c0_22, %c0_23] : memref<1x1xf32, #tpu.memory_space<vmem>>, vector<1x1xf32>
      tpu.vector_store %arg3[%c0_22, %c0_23], %47 {strides = array<i32>} : memref<1x1xf32, #tpu.memory_space<vmem>>, vector<1x1xf32>,
    } else {
    }
    %c0 = arith.constant 0 : index
    %c0_1 = arith.constant 0 : index
    %3 = vector.load %arg1[%c0, %c0_1] : memref<2x384xf32, #tpu.memory_space<vmem>>, vector<2x384xf32>
    %c0_2 = arith.constant 0 : index
    %c0_3 = arith.constant 0 : index
    %4 = vector.load %arg2[%c0_2, %c0_3] : memref<1x384xi32, #tpu.memory_space<vmem>>, vector<1x384xi32>
    %5 = vector.extract_strided_slice %3 {offsets = [0, 0], sizes = [1, 384], strides = [1, 1]} : vector<2x384xf32> to vector<1x384xf32>
    %6 = vector.extract_strided_slice %3 {offsets = [1, 0], sizes = [1, 384], strides = [1, 1]} : vector<2x384xf32> to vector<1x384xf32>
    %c0_i32_4 = arith.constant 0 : i32
    %7 = vector.broadcast %c0_i32_4 : i32 to vector<1x384xi32>
    %8 = arith.cmpi eq, %4, %7 : vector<1x384xi32>
    %9 = arith.subf %6, %5 : vector<1x384xf32>
    %cst = arith.constant 0.000000e+00 : f32
    %10 = vector.broadcast %cst : f32 to vector<1x384xf32>
    %11 = arith.subf %10, %9 : vector<1x384xf32>
    %12 = arith.select %8, %9, %11 : vector<1x384xi1>, vector<1x384xf32>
    %cst_5 = arith.constant 0.000000e+00 : f32
    %13 = vector.broadcast %cst_5 : f32 to vector<1x384xf32>
    %14 = arith.maximumf %12, %13 : vector<1x384xf32>
    %15 = math.absf %12 : vector<1x384xf32>
    %cst_6 = arith.constant 0.000000e+00 : f32
    %16 = vector.broadcast %cst_6 : f32 to vector<1x384xf32>
    %17 = arith.subf %16, %15 : vector<1x384xf32>
    %18 = math.exp %17 : vector<1x384xf32>
    %cst_7 = arith.constant 1.000000e+00 : f32
    %19 = vector.broadcast %cst_7 : f32 to vector<1x384xf32>
    %20 = arith.addf %19, %18 : vector<1x384xf32>
    %21 = math.log %20 : vector<1x384xf32>
    %22 = arith.addf %14, %21 : vector<1x384xf32>
    %cst_8 = arith.constant 0.000000e+00 : f32
    %23 = vector.broadcast %cst_8 : f32 to vector<1x384xf32>
    %24 = arith.subf %23, %22 : vector<1x384xf32>
    %cst_9 = arith.constant 0.0946637317 : f32
    %cst_10 = arith.constant 0.90533626 : f32
    %25 = vector.broadcast %cst_9 : f32 to vector<1x384xf32>
    %26 = vector.broadcast %cst_10 : f32 to vector<1x384xf32>
    %27 = arith.select %8, %25, %26 : vector<1x384xi1>, vector<1x384xf32>
    %cst_11 = arith.constant 0.000000e+00 : f32
    %28 = vector.broadcast %cst_11 : f32 to vector<1x384xf32>
    %29 = arith.subf %28, %27 : vector<1x384xf32>
    %30 = arith.mulf %29, %24 : vector<1x384xf32>
    %31 = tpu.iota {dimensions = array<i32: 1>} : vector<1x384xi32>
    %c384_i32 = arith.constant 384 : i32
    %32 = arith.muli %arg0, %c384_i32 : i32
    %33 = vector.broadcast %32 : i32 to vector<1x384xi32>
    %34 = arith.addi %33, %31 : vector<1x384xi32>
    %c384_i32_12 = arith.constant 384 : i32
    %35 = vector.broadcast %c384_i32_12 : i32 to vector<1x384xi32>
    %36 = arith.cmpi slt, %34, %35 : vector<1x384xi32>
    %cst_13 = arith.constant 0.000000e+00 : f32
    %37 = vector.broadcast %cst_13 : f32 to vector<1x384xf32>
    %38 = arith.select %36, %30, %37 : vector<1x384xi1>, vector<1x384xf32>
    %cst_14 = arith.constant dense<0.000000e+00> : vector<1xf32>
    %39 = vector.multi_reduction <add>, %38, %cst_14 [1] : vector<1x384xf32> to vector<1xf32>
    %40 = vector.shape_cast %39 : vector<1xf32> to vector<1x1xf32>
    %c0_15 = arith.constant 0 : index
    %c0_16 = arith.constant 0 : index
    %41 = vector.load %arg3[%c0_15, %c0_16] : memref<1x1xf32, #tpu.memory_space<vmem>>, vector<1x1xf32>
    %42 = arith.addf %41, %40 : vector<1x1xf32>
    %c0_17 = arith.constant 0 : index
    %c0_18 = arith.constant 0 : index
    %43 = vector.load %arg3[%c0_17, %c0_18] : memref<1x1xf32, #tpu.memory_space<vmem>>, vector<1x1xf32>
    tpu.vector_store %arg3[%c0_17, %c0_18], %42 {strides = array<i32>} : memref<1x1xf32, #tpu.memory_space<vmem>>, vector<1x1xf32>,
    %c0_i32_19 = arith.constant 0 : i32
    %44 = arith.cmpi eq, %arg0, %c0_i32_19 : i32
    %45 = arith.extui %44 : i1 to i32
    %c0_i32_20 = arith.constant 0 : i32
    %46 = arith.cmpi ne, %45, %c0_i32_20 : i32
    scf.if %46 {
      %c0_21 = arith.constant 0 : index
      %c0_22 = arith.constant 0 : index
      %47 = vector.load %arg3[%c0_21, %c0_22] : memref<1x1xf32, #tpu.memory_space<vmem>>, vector<1x1xf32>
      %cst_23 = arith.constant 3.840000e+02 : f32
      %48 = vector.broadcast %cst_23 : f32 to vector<1x1xf32>
      %49 = arith.divf %47, %48 : vector<1x1xf32>
      %c0_24 = arith.constant 0 : index
      %c0_25 = arith.constant 0 : index
      %50 = vector.load %arg3[%c0_24, %c0_25] : memref<1x1xf32, #tpu.memory_space<vmem>>, vector<1x1xf32>
      tpu.vector_store %arg3[%c0_24, %c0_25], %49 {strides = array<i32>} : memref<1x1xf32, #tpu.memory_space<vmem>>, vector<1x1xf32>,
    } else {
    }
    return
  }
  func.func @transform_0(%arg0: i32) -> (i32, i32) {
    %c0_i32 = arith.constant 0 : i32
    %c0_i32_0 = arith.constant 0 : i32
    return %c0_i32, %arg0 : i32, i32
  }
  func.func @transform_1(%arg0: i32) -> (i32, i32) {
    %c0_i32 = arith.constant 0 : i32
    %c0_i32_0 = arith.constant 0 : i32
    return %c0_i32, %arg0 : i32, i32
  }
  func.func @transform_2(%arg0: i32) -> (i32, i32) {
    %c0_i32 = arith.constant 0 : i32
    %c0_i32_0 = arith.constant 0 : i32
    %c0_i32_1 = arith.constant 0 : i32
    return %c0_i32, %c0_i32_0 : i32, i32
  }
}

</mosaic_0001>

<bundles_post_ra>
// kernel: tpu_custom_call.1
= control target key start
LH: loop header
LB: loop body
LE: loop exit
PB: predicated region body
PF: predicated region fallthrough
CT: control target
= control target key end

     0   :  { %7 = vsyncpa [#allocation3], 0  ;;  %s244_s0 = inlined_call_operand.hbm [shape: f32[2,384], index: 0, kind: input, shape index: {}]   ;;  %s245_s1 = inlined_call_operand.vmem [shape: s32[1,384], index: 1, kind: input, shape index: {}]   ;;  %s246_s2 = inlined_call_operand.hbm [shape: f32[1,1], index: 2, kind: output, shape index: {}]  }
   0x1   :  { %8 = vsyncpa [#allocation4], 0  ;;  %s194_s9 = smov [#allocation2]   ;;  %s146_s13 = scalar_lea.hbm %s244_s0, 96 }
   0x2   :  { %s15_s10 = sshll.u32 %s194_s9, 4  ;;  %p147_p0 = scmp.ne.s32.totalorder %s244_s0, %s146_s13  ;;  %s16_s10 = int_to_ptr.vmem [resolvable:$true] %s15_s10 }
   0x3   :  { %p150_p1 = scmp.lt.u32.totalorder %s146_s13, %s244_s0 }
   0x5   :  { %p152_p2 = pnand %p150_p1, %p147_p0 }
   0x7   :  { %155 = shalt.err (!%p152_p2)
}
   0x8   :  { %s156_s18 = scalar_lea.vmem %s16_s10, 96  ;;  %p161_p4 = scmp.lt.s32.totalorder %s16_s10, %s16_s10 }
   0x9   :  { %p157_p3 = scmp.ne.s32.totalorder %s16_s10, %s156_s18  ;;  %p162_p5 = scmp.lt.s32.totalorder %s156_s18, %s156_s18 }
   0xb   :  { %p163_p6 = por %p162_p5, %p161_p4 }
   0xd   :  { %p164_p7 = pnand %p163_p6, %p157_p3 }
   0xf   :  { %167 = shalt.err (!%p164_p7)
}
  0x10   :  { %18 = dma.hbm_to_vmem [thread:$0]  %s244_s0, 96, %s16_s10, [#allocation3]  }
  0x11   :  { %190 = dma.done.wait [#allocation3], 96  }
  0x12   :  { %191 = vsyncadd [#allocation3], 4294967200  ;;  %v42_v0 = vlaneseq  ;;  %v195_v1 = vmov 1966171168   ;;  %vm28_vm0 = vcmask 0   ;;  %v196_v3 = vmov 0.0  }
  0x13   :  { %v40_v2 = vunpack.c.l.s4 %v195_v1  ;;  %29 = vst.msk [vmem:[#allocation5] sm:$0x1] %vm28_vm0, %v196_v3  ;;  %v30_v6 = vld [vmem:[#allocation2] sm:$0x3f]  ;;  %v197_v24 = vmov 0.90533626  }
  0x14   :  { %v43_v5 = vshrl.u32 %v42_v0, 7  ;;  %v34_v7 = vrot.slane %v30_v6, 7  ;;  %v31_v10 = vld [vmem:[%s245_s1] sm:$0x7]  ;;  %vm103_vm2 = vcmask 1040384   ;;  %s198_s0 = smov [#allocation5]  }
  0x15   :  { %v41_v4 = vunpack.c.0.s8 %v40_v2  ;;  %vm32_vm1 = vcmp.eq.s32.totalorder %v31_v10, 0  ;;  %s128_s1 = sshll.u32 %s198_s0, 4  ;;  %s129_s1 = int_to_ptr.vmem [resolvable:$true] %s128_s1 }
  0x16   :  { %v36_v9 = vsub.f32 %v30_v6, %v34_v7  ;;  %v69_v25 = vsel %vm32_vm1, 0.09466373, %v197_v24  ;;  %v87_v30 = vsub.s32 0, %v43_v5  ;;  %v91_v31 = vsub.s32 1, %v43_v5  ;;  %s168_s23 = scalar_lea.vmem %s129_s1, 16  ;;  %s172_s24 = scalar_lea.vmem %s129_s1, 32 }
  0x17   :  { %v44_v8 = vsub.s32 %v41_v4, %v43_v5  ;;  %v70_v28 = vsub.f32 0.0, %v69_v25  ;;  %v95_v32 = vsub.s32 2, %v43_v5  ;;  %p169_p8 = scmp.ne.s32.totalorder %s129_s1, %s168_s23  ;;  %p173_p9 = scmp.lt.s32.totalorder %s129_s1, %s129_s1 }
  0x18   :  { %v37_v11 = vsub.f32 0.0, %v36_v9  ;;  %p174_p10 = scmp.lt.s32.totalorder %s172_s24, %s168_s23 }
  0x19   :  { %v45_v12 = vrot.slane %v36_v9, %v44_v8 }
  0x1a   :  { %v55_v14 = vrot.slane %v37_v11, %v44_v8  ;;  %v111_v42 = vld [vmem:[#allocation5] sm:$0x1]  ;;  %p175_p11 = por %p174_p10, %p173_p9 }
  0x1b   :  { %v46_v13 = vcombine.high %v45_v12, %v45_v12 }
  0x1c   :  { %v56_v15 = vcombine.high %v55_v14, %v55_v14  ;;  %p176_p12 = pnand %p175_p11, %p169_p8 }
  0x1e   :  { %v58_v16 = vsel %vm32_vm1, %v46_v13, %v56_v15 }
  0x1f   :  { %v60_v17 = vand.u32 2147483647, %v58_v16  ;;  %v59_v22 = vmax.f32 %v58_v16, 0.0 }
  0x21   :  { %v61_v18 = vsub.f32 0.0, %v60_v17 }
  0x23   :  { %v62_v19 = vmul.f32 1.442695, %v61_v18 }
  0x25   :  { %142 = vpow2.f32 %v62_v19 }
  0x2f   :  { %v143_v20 = vpop.eup %142 }
  0x30   :  { %v64_v21 = vadd.f32 1.0, %v143_v20 }
  0x32   :  { %144 = vlog2.f32 %v64_v21 }
  0x3c   :  { %v145_v23 = vpop.eup %144 }
  0x3d   :  { %v66_v26 = vmul.f32 0.6931472, %v145_v23 }
  0x3f   :  { %v67_v27 = vadd.f32 %v66_v26, %v59_v22 }
  0x41   :  { %v68_v29 = vsub.f32 0.0, %v67_v27 }
  0x43   :  { %v71_v33 = vmul.f32 %v70_v28, %v68_v29 }
  0x45   :  { %v88_v34 = vrot.slane %v71_v33, %v87_v30  ;;  %v92_v35 = vrot.slane %v71_v33, %v91_v31  ;;  %v96_v36 = vrot.slane %v71_v33, %v95_v32 }
  0x47   :  { %v104_v37 = vsel %vm103_vm2, %v88_v34, 0.0  ;;  %v105_v38 = vsel %vm103_vm2, %v92_v35, 0.0  ;;  %v107_v39 = vsel %vm103_vm2, %v96_v36, 0.0 }
  0x48   :  { %v106_v40 = vadd.f32 %v105_v38, %v104_v37 }
  0x4a   :  { %v108_v41 = vadd.f32 %v107_v39, %v106_v40 }
  0x4c   :  { %109 = vadd.xlane.f32.xlu0 %v108_v41 }
  0xd9   :  { %v110_v43 = vpop.xlane.xlu0 %109 }
  0xda   :  { %v112_v44 = vadd.f32 %v111_v42, %v110_v43 }
  0xdc   :  { %114 = vst.msk [vmem:[#allocation5] sm:$0x1] %vm28_vm0, %v112_v44 }
  0xe3   :  { %v118_v45 = vld [vmem:[#allocation5] sm:$0x1] }
  0xe4   :  { %v120_v46 = vmul.f32 0.0026041667, %v118_v45 }
  0xe6   :  { %121 = vst.msk [vmem:[#allocation5] sm:$0x1] %vm28_vm0, %v120_v46 }
  0xe7   :  { %179 = shalt.err (!%p176_p12)
}
  0xe8   :  { %s180_s27 = scalar_lea.hbm %s246_s2, 16 }
  0xe9   :  { %p181_p13 = scmp.ne.s32.totalorder %s246_s2, %s180_s27  ;;  %p184_p0 = scmp.lt.u32.totalorder %s180_s27, %s246_s2 }
  0xeb   :  { %p186_p1 = pnand %p184_p0, %p181_p13 }
  0xed   :  { %189 = shalt.err (!%p186_p1)
}
  0xee   :  { %131 = dma.vmem_to_hbm [thread:$0]  %s129_s1, 16, %s246_s2, [#allocation4]  }
  0xef   :  { %192 = dma.done.wait [#allocation4], 16  }
  0xf0   :  { %193 = vsyncadd [#allocation4], 4294967280 }
  0xf1   :  { %135 = vsyncpa [#allocation3], 1 }
  0xf2   :  { %136 = vsyncpa [#allocation4], 1 }

</bundles_post_ra>
